<compile_context>
chip_gen: v7x
topology: tpu7x:2x2x1
jax: 0.10.0
libtpu: 0.0.40
codegen_flags: <defaults>
</compile_context>

<pallas_src>
import functools

import numpy as np
import jax
import jax.numpy as jnp
from jax.experimental import pallas as pl
from jax.experimental.pallas import tpu as pltpu


def _lout(lin, k, stride):
    # floor((Lin - (k-1) - 1) / stride) + 1  (padding=0, dilation=1)
    return (lin - (k - 1) - 1) // stride + 1


def _pool_select_np(lin, pk, ps):
    """0/1 matrix S, shape (lin-pk+1, P) with S[j*ps, j] = 1.

    Applied to the running-max array m (m[:, i] = max_{d<pk} y[:, i+d]),
    m @ S gives MaxPool1d(pk, ps)(y).
    """
    lw = lin - pk + 1
    p = (lin - pk) // ps + 1
    s = np.zeros((lw, p), np.float32)
    s[np.arange(p) * ps, np.arange(p)] = 1.0
    return s


def _conv_band_np(lin, w, stride):
    """Band matrix C, shape (lin, lout), with C[j*stride + k, j] = w[k]."""
    k = w.shape[0]
    lout = (lin - k) // stride + 1
    c = np.zeros((lin, lout), np.float32)
    for j in range(lout):
        c[j * stride:j * stride + k, j] = w
    return c


def conv_mlp_kernel(scal_ref, x_ref, a_ref, w3_ref, b3_ref, out_ref,
                    *, K, pk, L1, L2):
    # One vld of the input slab; all intermediates stay in vregs.
    x = x_ref[...]                                          # (tile_b, L) f32

    # conv1 (stride=1): K shifted multiply-adds on the VPU (static lane-offset
    # value slices -> lane shifts, no VMEM round-trip), + bias, ReLU.
    acc1 = scal_ref[0] * x[:, 0:L1]
    for k in range(1, K):
        acc1 = acc1 + scal_ref[k] * x[:, k:k + L1]
    y1 = jnp.maximum(acc1 + scal_ref[K], 0.0)               # (tile_b, L1)

    # max_pool1 running max over pk shifted windows (VPU).
    # Dropout(0.1) == identity in eval mode.
    mw1 = L1 - pk + 1
    m1 = y1[:, 0:mw1]
    for d in range(1, pk):
        m1 = jnp.maximum(m1, y1[:, d:d + mw1])              # (tile_b, mw1)

    # pool1's stride-ps downselect fused with conv2's band matrix on the host:
    # acc2 = m1 @ (sel1 @ band(w2))  -- one small MXU matmul (exact fold).
    acc2 = jnp.dot(m1, a_ref[...], preferred_element_type=jnp.float32)
    y2 = jnp.maximum(acc2 + scal_ref[K + 1], 0.0)           # (tile_b, L2)

    # max_pool2 running max; its stride-ps downselect is folded into fc3.
    mw2 = L2 - pk + 1
    m2 = y2[:, 0:mw2]
    for d in range(1, pk):
        m2 = jnp.maximum(m2, y2[:, d:d + mw2])              # (tile_b, mw2)

    # fc3 (with pool2 selection folded in) + pre-broadcast bias + sigmoid;
    # lane-dense (tile_b, 128) unmasked store.
    logits = jnp.dot(m2, w3_ref[...],
                     preferred_element_type=jnp.float32) + b3_ref[...]
    out_ref[...] = jax.nn.sigmoid(logits)


def conv_forward(x_bl, w1, b1, w2, b2, w3, b3, *,
                 kernel_size, stride, pool_k, pool_s, output_dim):
    """x_bl: (B, L) float32 (channel dim already squeezed); PyTorch weights."""
    assert stride == 1, "TODO(synk): only stride=1 conv implemented"
    B, L = x_bl.shape
    L1 = _lout(L, kernel_size, stride)
    P1 = _lout(L1, pool_k, pool_s)
    L2 = _lout(P1, kernel_size, stride)
    P2 = _lout(L2, pool_k, pool_s)
    mw1 = L1 - pool_k + 1
    mw2 = L2 - pool_k + 1

    # Batch tile: full 8-sublane occupancy; cap the per-step tile for large
    # batches (a (512, 64) f32 x-tile is ~128 KiB -> fine on v5e/v6e/v7x VMEM).
    tile_b = min(512, max(8, ((B + 7) // 8) * 8))
    Bp = ((B + tile_b - 1) // tile_b) * tile_b
    Opad = max(128, ((output_dim + 127) // 128) * 128)      # lane-dense output

    # ---- host-side folds (sel matrices are 0/1 -> folds are exact in f32) ----
    w1_np = np.asarray(w1, np.float32).reshape(-1)
    w2_np = np.asarray(w2, np.float32).reshape(-1)
    sel1 = _pool_select_np(L1, pool_k, pool_s)              # (mw1, P1)
    sel2 = _pool_select_np(L2, pool_k, pool_s)              # (mw2, P2)
    band2 = _conv_band_np(P1, w2_np, stride)                # (P1,  L2)
    a_mat = jnp.asarray(sel1 @ band2)                       # (mw1, L2)
    w3_pad = np.zeros((P2, Opad), np.float32)
    w3_pad[:, :output_dim] = np.asarray(w3, np.float32).T
    w3_fused = jnp.asarray(sel2 @ w3_pad)                   # (mw2, Opad)
    b3_bcast = np.zeros((tile_b, Opad), np.float32)
    b3_bcast[:, :output_dim] = np.asarray(b3, np.float32).reshape(1, -1)
    b3_bcast = jnp.asarray(b3_bcast)

    # Packed conv scalars for SMEM: [w1_0 .. w1_{K-1}, b1, b2]
    scal = jnp.asarray(np.concatenate(
        [w1_np, np.asarray(b1, np.float32).reshape(1),
         np.asarray(b2, np.float32).reshape(1)]))

    x_pad = jnp.zeros((Bp, L), jnp.float32).at[:B].set(x_bl.astype(jnp.float32))

    kern = functools.partial(conv_mlp_kernel, K=kernel_size, pk=pool_k,
                             L1=L1, L2=L2)

    grid = (Bp // tile_b,)
    flops = Bp * (2 * kernel_size * L1 + 2 * mw1 * L2 + 2 * mw2 * Opad)
    bytes_accessed = 4 * (Bp * L + int(scal.size) + int(a_mat.size)
                          + int(w3_fused.size) + int(b3_bcast.size) + Bp * Opad)

    out_pad = pl.pallas_call(
        kern,
        out_shape=jax.ShapeDtypeStruct((Bp, Opad), jnp.float32),
        grid=grid,
        in_specs=[
            pl.BlockSpec(memory_space=pltpu.MemorySpace.SMEM),      # scalars
            pl.BlockSpec((tile_b, L), lambda i: (i, 0)),            # x
            pl.BlockSpec((mw1, L2), lambda i: (0, 0)),              # A (fused)
            pl.BlockSpec((mw2, Opad), lambda i: (0, 0)),            # w3 fused
            pl.BlockSpec((tile_b, Opad), lambda i: (0, 0)),         # b3 bcast
        ],
        out_specs=pl.BlockSpec((tile_b, Opad), lambda i: (i, 0)),
        compiler_params=pltpu.CompilerParams(
            dimension_semantics=("parallel",)),
        cost_estimate=pl.CostEstimate(flops=flops,
                                      transcendentals=Bp * Opad,
                                      bytes_accessed=bytes_accessed),
    )(scal, x_pad, a_mat, w3_fused, b3_bcast)

    return out_pad[:B, :output_dim]


def _reference_np(x_bl, w1, b1, w2, b2, w3, b3, *,
                  kernel_size, stride, pool_k, pool_s):
    def conv(x, w, b):
        lout = (x.shape[1] - kernel_size) // stride + 1
        out = np.zeros((x.shape[0], lout), np.float32)
        for i in range(lout):
            out[:, i] = x[:, i * stride:i * stride + kernel_size] @ w + b
        return out

    def pool(x):
        lout = (x.shape[1] - pool_k) // pool_s + 1
        out = np.zeros((x.shape[0], lout), np.float32)
        for i in range(lout):
            out[:, i] = x[:, i * pool_s:i * pool_s + pool_k].max(axis=1)
        return out

    y = np.maximum(conv(x_bl, w1, b1[0]), 0.0)
    y = pool(y)
    y = np.maximum(conv(y, w2, b2[0]), 0.0)
    y = pool(y)
    z = y @ w3.T + b3
    return 1.0 / (1.0 + np.exp(-z))


if __name__ == "__main__":
    # Hyper-parameters implied by CONV.__init__
    input_dim = 64
    kernel_size = 3
    stride = 1
    max_pool_kernel_size = 2
    max_pool_stride = 2
    output_dim = 8
    B = 2

    L1 = _lout(input_dim, kernel_size, stride)              # 62
    P1 = _lout(L1, max_pool_kernel_size, max_pool_stride)   # 31
    L2 = _lout(P1, kernel_size, stride)                     # 29
    P2 = _lout(L2, max_pool_kernel_size, max_pool_stride)   # 14 -> fc3: Linear(14, 8)

    key = jax.random.PRNGKey(0)
    kx, k1, kb1, k2, kb2, k3, kb3 = jax.random.split(key, 7)

    # PyTorch shapes: conv weight (1,1,K) -> (K,), bias (1,);
    # fc3 weight (output_dim, P2), bias (output_dim,)
    x = jax.random.normal(kx, (B, 1, input_dim), jnp.float32)
    w1 = 0.5 * jax.random.normal(k1, (kernel_size,), jnp.float32)
    b1 = 0.1 * jax.random.normal(kb1, (1,), jnp.float32)
    w2 = 0.5 * jax.random.normal(k2, (kernel_size,), jnp.float32)
    b2 = 0.1 * jax.random.normal(kb2, (1,), jnp.float32)
    w3 = 0.3 * jax.random.normal(k3, (output_dim, P2), jnp.float32)
    b3 = 0.1 * jax.random.normal(kb3, (output_dim,), jnp.float32)

    x_bl = x[:, 0, :]  # squeeze channel dim (C == 1)

    out = conv_forward(x_bl, w1, b1, w2, b2, w3, b3,
                       kernel_size=kernel_size, stride=stride,
                       pool_k=max_pool_kernel_size, pool_s=max_pool_stride,
                       output_dim=output_dim)
    out = jax.block_until_ready(out)

    ref = _reference_np(np.asarray(x_bl), np.asarray(w1), np.asarray(b1),
                        np.asarray(w2), np.asarray(b2),
                        np.asarray(w3), np.asarray(b3),
                        kernel_size=kernel_size, stride=stride,
                        pool_k=max_pool_kernel_size, pool_s=max_pool_stride)

    assert out.shape == (B, output_dim), out.shape
    np.testing.assert_allclose(np.asarray(out), ref, rtol=1e-4, atol=1e-5)
    print("KERNEL_OK")
</pallas_src>

<mosaic_0001>
module attributes {stable_mosaic.version = 11 : i64} {
  func.func @conv_mlp_kernel(%arg0: i32, %arg1: memref<5xf32, #tpu.memory_space<smem>>, %arg2: memref<8x64xf32, #tpu.memory_space<vmem>>, %arg3: memref<61x29xf32, #tpu.memory_space<vmem>>, %arg4: memref<28x128xf32, #tpu.memory_space<vmem>>, %arg5: memref<8x128xf32, #tpu.memory_space<vmem>>, %arg6: memref<8x128xf32, #tpu.memory_space<vmem>>) attributes {dimension_semantics = [#tpu.dimension_semantics<parallel>], iteration_bounds = array<i64: 1>, scalar_prefetch = 0 : i64, scratch_operands = 0 : i64, tpu.core_type = #tpu.core_type<tc>, window_params = [{transform_indices = @transform_0, window_bounds = array<i64: 5>}, {transform_indices = @transform_1, window_bounds = array<i64: 8, 64>}, {pipeline_mode = #tpu.pipeline_mode<synchronous>, transform_indices = @transform_2, window_bounds = array<i64: 61, 29>}, {pipeline_mode = #tpu.pipeline_mode<synchronous>, transform_indices = @transform_3, window_bounds = array<i64: 28, 128>}, {pipeline_mode = #tpu.pipeline_mode<synchronous>, transform_indices = @transform_4, window_bounds = array<i64: 8, 128>}, {transform_indices = @transform_5, window_bounds = array<i64: 8, 128>}]} {
    %c0 = arith.constant 0 : index
    %c0_0 = arith.constant 0 : index
    %0 = vector.load %arg2[%c0, %c0_0] : memref<8x64xf32, #tpu.memory_space<vmem>>, vector<8x64xf32>
    %c0_1 = arith.constant 0 : index
    %1 = memref.load %arg1[%c0_1] : memref<5xf32, #tpu.memory_space<smem>>
    %2 = vector.extract_strided_slice %0 {offsets = [0, 0], sizes = [8, 62], strides = [1, 1]} : vector<8x64xf32> to vector<8x62xf32>
    %3 = vector.broadcast %1 : f32 to vector<8x62xf32>
    %4 = arith.mulf %3, %2 : vector<8x62xf32>
    %c1 = arith.constant 1 : index
    %5 = memref.load %arg1[%c1] : memref<5xf32, #tpu.memory_space<smem>>
    %6 = vector.extract_strided_slice %0 {offsets = [0, 1], sizes = [8, 62], strides = [1, 1]} : vector<8x64xf32> to vector<8x62xf32>
    %7 = vector.broadcast %5 : f32 to vector<8x62xf32>
    %8 = arith.mulf %7, %6 : vector<8x62xf32>
    %9 = arith.addf %4, %8 : vector<8x62xf32>
    %c2 = arith.constant 2 : index
    %10 = memref.load %arg1[%c2] : memref<5xf32, #tpu.memory_space<smem>>
    %11 = vector.extract_strided_slice %0 {offsets = [0, 2], sizes = [8, 62], strides = [1, 1]} : vector<8x64xf32> to vector<8x62xf32>
    %12 = vector.broadcast %10 : f32 to vector<8x62xf32>
    %13 = arith.mulf %12, %11 : vector<8x62xf32>
    %14 = arith.addf %9, %13 : vector<8x62xf32>
    %c3 = arith.constant 3 : index
    %15 = memref.load %arg1[%c3] : memref<5xf32, #tpu.memory_space<smem>>
    %16 = vector.broadcast %15 : f32 to vector<8x62xf32>
    %17 = arith.addf %14, %16 : vector<8x62xf32>
    %cst = arith.constant 0.000000e+00 : f32
    %18 = vector.broadcast %cst : f32 to vector<8x62xf32>
    %19 = arith.maximumf %17, %18 : vector<8x62xf32>
    %20 = vector.extract_strided_slice %19 {offsets = [0, 0], sizes = [8, 61], strides = [1, 1]} : vector<8x62xf32> to vector<8x61xf32>
    %21 = vector.extract_strided_slice %19 {offsets = [0, 1], sizes = [8, 61], strides = [1, 1]} : vector<8x62xf32> to vector<8x61xf32>
    %22 = arith.maximumf %20, %21 : vector<8x61xf32>
    %c0_2 = arith.constant 0 : index
    %c0_3 = arith.constant 0 : index
    %23 = vector.load %arg3[%c0_2, %c0_3] : memref<61x29xf32, #tpu.memory_space<vmem>>, vector<61x29xf32>
    %cst_4 = arith.constant dense<0.000000e+00> : vector<8x29xf32>
    %24 = tpu.matmul %22, %23, %cst_4 {dimension_numbers = #tpu.dot_dimension_numbers<[1], [0], [0], [1], [0, 0, 1, 1], [], []>} : vector<8x61xf32>, vector<61x29xf32>, vector<8x29xf32> -> vector<8x29xf32>
    %c4 = arith.constant 4 : index
    %25 = memref.load %arg1[%c4] : memref<5xf32, #tpu.memory_space<smem>>
    %26 = vector.broadcast %25 : f32 to vector<8x29xf32>
    %27 = arith.addf %24, %26 : vector<8x29xf32>
    %cst_5 = arith.constant 0.000000e+00 : f32
    %28 = vector.broadcast %cst_5 : f32 to vector<8x29xf32>
    %29 = arith.maximumf %27, %28 : vector<8x29xf32>
    %30 = vector.extract_strided_slice %29 {offsets = [0, 0], sizes = [8, 28], strides = [1, 1]} : vector<8x29xf32> to vector<8x28xf32>
    %31 = vector.extract_strided_slice %29 {offsets = [0, 1], sizes = [8, 28], strides = [1, 1]} : vector<8x29xf32> to vector<8x28xf32>
    %32 = arith.maximumf %30, %31 : vector<8x28xf32>
    %c0_6 = arith.constant 0 : index
    %c0_7 = arith.constant 0 : index
    %33 = vector.load %arg4[%c0_6, %c0_7] : memref<28x128xf32, #tpu.memory_space<vmem>>, vector<28x128xf32>
    %cst_8 = arith.constant dense<0.000000e+00> : vector<8x128xf32>
    %34 = tpu.matmul %32, %33, %cst_8 {dimension_numbers = #tpu.dot_dimension_numbers<[1], [0], [0], [1], [0, 0, 1, 1], [], []>} : vector<8x28xf32>, vector<28x128xf32>, vector<8x128xf32> -> vector<8x128xf32>
    %c0_9 = arith.constant 0 : index
    %c0_10 = arith.constant 0 : index
    %35 = vector.load %arg5[%c0_9, %c0_10] : memref<8x128xf32, #tpu.memory_space<vmem>>, vector<8x128xf32>
    %36 = arith.addf %34, %35 : vector<8x128xf32>
    %37 = arith.negf %36 : vector<8x128xf32>
    %38 = math.exp %37 : vector<8x128xf32>
    %cst_11 = arith.constant 1.000000e+00 : f32
    %39 = vector.broadcast %cst_11 : f32 to vector<8x128xf32>
    %40 = arith.addf %39, %38 : vector<8x128xf32>
    %41 = arith.divf %39, %40 : vector<8x128xf32>
    %c0_12 = arith.constant 0 : index
    %c0_13 = arith.constant 0 : index
    %42 = vector.load %arg6[%c0_12, %c0_13] : memref<8x128xf32, #tpu.memory_space<vmem>>, vector<8x128xf32>
    tpu.vector_store %arg6[%c0_12, %c0_13], %41 {strides = array<i32>} : memref<8x128xf32, #tpu.memory_space<vmem>>, vector<8x128xf32>,
    return
  }
  func.func @transform_0(%arg0: i32) -> i32 {
    %c0_i32 = arith.constant 0 : i32
    %c0_i32_0 = arith.constant 0 : i32
    return %c0_i32 : i32
  }
  func.func @transform_1(%arg0: i32) -> (i32, i32) {
    %c0_i32 = arith.constant 0 : i32
    %c0_i32_0 = arith.constant 0 : i32
    return %arg0, %c0_i32 : i32, i32
  }
  func.func @transform_2(%arg0: i32) -> (i32, i32) {
    %c0_i32 = arith.constant 0 : i32
    %c0_i32_0 = arith.constant 0 : i32
    %c0_i32_1 = arith.constant 0 : i32
    return %c0_i32, %c0_i32_0 : i32, i32
  }
  func.func @transform_3(%arg0: i32) -> (i32, i32) {
    %c0_i32 = arith.constant 0 : i32
    %c0_i32_0 = arith.constant 0 : i32
    %c0_i32_1 = arith.constant 0 : i32
    return %c0_i32, %c0_i32_0 : i32, i32
  }
  func.func @transform_4(%arg0: i32) -> (i32, i32) {
    %c0_i32 = arith.constant 0 : i32
    %c0_i32_0 = arith.constant 0 : i32
    %c0_i32_1 = arith.constant 0 : i32
    return %c0_i32, %c0_i32_0 : i32, i32
  }
  func.func @transform_5(%arg0: i32) -> (i32, i32) {
    %c0_i32 = arith.constant 0 : i32
    %c0_i32_0 = arith.constant 0 : i32
    return %arg0, %c0_i32 : i32, i32
  }
}

</mosaic_0001>

<bundles_post_ra>
// kernel: tpu_custom_call.1
= control target key start
LH: loop header
LB: loop body
LE: loop exit
PB: predicated region body
PF: predicated region fallthrough
CT: control target
= control target key end

     0   :  { %10 = vsyncpa [#allocation4], 0  ;;  %s485_s0 = inlined_call_operand.vmem [shape: f32[5], index: 0, kind: input, shape index: {}]   ;;  %s486_s1 = inlined_call_operand.vmem [shape: f32[8,64], index: 1, kind: input, shape index: {}]   ;;  %s487_s2 = inlined_call_operand.vmem [shape: f32[61,29], index: 2, kind: input, shape index: {}]   ;;  %s488_s3 = inlined_call_operand.vmem [shape: f32[28,128], index: 3, kind: input, shape index: {}]   ;;  %s489_s4 = inlined_call_operand.vmem [shape: f32[8,128], index: 4, kind: input, shape index: {}]   ;;  %s490_s5 = inlined_call_operand.hbm [shape: f32[8,128], index: 5, kind: output, shape index: {}]  }
   0x1   :  { %11 = vsyncpa [#allocation3], 0  ;;  %s18_s20 = sshll.u32 %s485_s0, 4  ;;  %s19_s20 = int_to_ptr.vmem [resolvable:$true] %s18_s20 }
   0x2   :  { %s347_s21 = scalar_lea.vmem %s19_s20, 16  ;;  %p352_p1 = scmp.lt.s32.totalorder %s19_s20, %s19_s20 }
   0x3   :  { %p348_p0 = scmp.ne.s32.totalorder %s19_s20, %s347_s21  ;;  %p353_p2 = scmp.lt.s32.totalorder %s347_s21, %s347_s21 }
   0x5   :  { %p354_p3 = por %p353_p2, %p352_p1 }
   0x7   :  { %p355_p4 = pnand %p354_p3, %p348_p0 }
   0x9   :  { %358 = shalt.err (!%p355_p4)
}
   0xa   :  { %s385_s22 = smov [#allocation2]  }
   0xb   :  { %21 = dma.vmem_to_smem %s19_s20, 16, %s385_s22, [#allocation4]  }
   0xc   :  { %381 = dma.done.wait [#allocation4], 16  }
   0xd   :  { %382 = vsyncadd [#allocation4], 4294967280 }
   0xe   :  { %33 = sfence }
   0xf   :  { %s262_s23 = sld [smem:[#allocation2 + $0x1]]  ;;  %s263_s24 = sld [smem:[#allocation2 + $0x2]]  ;;  %v34_v0 = vld [vmem:[%s486_s1] sm:$0xff]  ;;  %v64_v3 = vld [vmem:[%s487_s2 + $0x8] sm:$0xff]  ;;  %v65_v4 = vld [vmem:[%s487_s2 + $0x10] sm:$0xff]  ;;  %v386_v7 = vmov 0.0|0.0  }
  0x10   :  { %v63_v2 = vld [vmem:[%s487_s2] sm:$0xff]  ;;  %315 = vmatprep.subr.bf16.mxu0 %v386_v7  ;;  %v66_v9 = vld [vmem:[%s487_s2 + $0x18] sm:$0xff]  ;;  %328 = vmatprep.subr.bf16.mxu1 %v386_v7  ;;  %s387_s8 = smov 127   ;;  %v68_v13 = vld [vmem:[%s487_s2 + $0x28] sm:$0xff]  ;;  %s388_s13 = smov 126   ;;  %vm77_vm0 = vcmask 1044480  }
  0x11   :  { %v316_v8 = vpack.c.bf16 %v64_v3, %v63_v2  ;;  %v319_v11 = vpack.c.bf16 %v66_v9, %v65_v4  ;;  %v67_v12 = vld [vmem:[%s487_s2 + $0x20] sm:$0xff]  ;;  %v69_v15 = vld [vmem:[%s487_s2 + $0x30] sm:$0xff]  ;;  %v70_v16 = vld [vmem:[%s487_s2 + $0x38] sm:$0x1f]  ;;  %vm389_vm1 = vmmov 1   ;;  %s35_s18 = sld [smem:[#allocation2]] }
  0x12   :  { %v322_v14 = vpack.c.bf16 %v68_v13, %v67_v12  ;;  %v325_v17 = vpack.c.bf16 %v70_v16, %v69_v15  ;;  %vm326_vm2 = vmpackc.low %vm77_vm0, %vm389_vm1  ;;  %s264_s19 = sld [smem:[#allocation2 + $0x3]]  ;;  %vm390_vm3 = vmmov 0   ;;  %v391_v20 = vmov 0.0   ;;  %v157_v30 = vld [vmem:[%s488_s3] sm:$0xff]  ;;  %v158_v31 = vld [vmem:[%s488_s3 + $0x8] sm:$0xff]  ;;  %s265_s0 = sld [smem:[#allocation2 + $0x4]] }
  0x13   :  { %317 = vmatpush3.bf16.msra.mxu0 %v316_v8  ;;  %301 = vmatprep.mubr.msk.f32.mxu0 %vm390_vm3, %v391_v20  ;;  %vm73_vm4 = vcmask 498688   ;;  %v159_v32 = vld [vmem:[%s488_s3 + $0x10] sm:$0xff]  ;;  %v329_v33 = vpack.c.bf16 %v158_v31, %v157_v30  ;;  %v160_v34 = vld [vmem:[%s488_s3 + $0x18] sm:$0xf]  ;;  %vm166_vm5 = vcmask 1043456   ;;  %vm162_vm7 = vcmask 228352  }
  0x14   :  { %318 = vmatprep.subr.bf16.mxu0 %v386_v7  ;;  %312 = vmatprep.mubr.msk.f32.mxu1 %vm390_vm3, %v391_v20  ;;  %v332_v35 = vpack.c.bf16 %v160_v34, %v159_v32  ;;  %vm333_vm6 = vmpackc.low %vm166_vm5, %vm389_vm1  ;;  %v161_v43 = vld [vmem:[%s489_s4] sm:$0xff]  ;;  %s392_s28 = smov [#allocation5]  }
  0x15   :  { %v39_v1 = vstv %s262_s23  ;;  %v47_v6 = vstv %s263_s24  ;;  %330 = vmatpush3.bf16.msra.mxu1 %v329_v33  ;;  %s253_s29 = sshll.u32 %s392_s28, 4  ;;  %s254_s29 = int_to_ptr.vmem [resolvable:$true] %s253_s29 }
  0x16   :  { %v40_v5 = vmul.f32 %v39_v1, %v34_v0  ;;  %v48_v10 = vmul.f32 %v47_v6, %v34_v0  ;;  %331 = vmatprep.subr.bf16.mxu1 %v386_v7  ;;  %s359_s30 = scalar_lea.vmem %s254_s29, 128  ;;  %p364_p6 = scmp.lt.s32.totalorder %s254_s29, %s254_s29 }
  0x17   :  { %320 = vmatpush3.bf16.msra.mxu0 %v319_v11  ;;  %v36_v18 = vstv %s35_s18  ;;  %p360_p5 = scmp.ne.s32.totalorder %s254_s29, %s359_s30  ;;  %p365_p7 = scmp.lt.s32.totalorder %s359_s30, %s359_s30 }
  0x18   :  { %42 = vrot.lane.b32.xlu0 %v40_v5, %s387_s8  ;;  %321 = vmatprep.subr.bf16.mxu0 %v386_v7  ;;  %v37_v19 = vmul.f32 %v36_v18, %v34_v0  ;;  %v55_v24 = vstv %s264_s19  ;;  %v72_v36 = vstv %s265_s0 }
  0x19   :  { %334 = vmatpush3.bf16.msk.msra.mxu1 %vm333_vm6, %v332_v35  ;;  %p366_p8 = por %p365_p7, %p364_p6 }
  0x1b   :  { %323 = vmatpush3.bf16.msra.mxu0 %v322_v14  ;;  %p367_p9 = pnand %p366_p8, %p360_p5 }
  0x1c   :  { %50 = vrot.lane.b32.xlu0 %v48_v10, %s388_s13  ;;  %324 = vmatprep.subr.bf16.mxu0 %v386_v7 }
  0x1f   :  { %327 = vmatpush3.bf16.msk.msra.mxu0 %vm326_vm2, %v325_v17 }
  0x8a   :  { %v43_v21 = vpop.permute.xlu0 %42 }
  0x8b   :  { %v45_v22 = vadd.f32 %v43_v21, %v37_v19 }
  0x8e   :  { %v51_v23 = vpop.permute.xlu0 %50 }
  0x8f   :  { %v53_v25 = vadd.f32 %v51_v23, %v45_v22 }
  0x91   :  { %v56_v26 = vadd.f32 %v55_v24, %v53_v25 }
  0x93   :  { %v57_v27 = vmax.f32 %v56_v26, 0.0 }
  0x95   :  { %59 = vrot.lane.b32.xlu1 %v57_v27, %s387_s8 }
 0x107   :  { %v60_v28 = vpop.permute.xlu1 %59 }
 0x108   :  { %v62_v29 = vmax.f32 %v57_v27, %v60_v28 }
 0x10a   :  { %302 = vmatmul.mubr.msk.f32.vlgmr.msra.gmra.mrb[0].mxu0 %vm73_vm4, %v62_v29 }
 0x1dd   :  { %v147_v37 = vpop.f32.mrb[0].mxu0 }
 0x1de   :  { %v148_v38 = vadd.f32 %v147_v37, %v72_v36  ;;  %v303_v39 = vpop.f32.mrb[1].mxu0 }
 0x1e0   :  { %v151_v40 = vmax.f32 %v148_v38, 0.0 }
 0x1e2   :  { %153 = vrot.lane.b32.xlu1 %v151_v40, %s387_s8 }
 0x254   :  { %v154_v41 = vpop.permute.xlu1 %153 }
 0x255   :  { %v156_v42 = vmax.f32 %v151_v40, %v154_v41 }
 0x257   :  { %313 = vmatmul.mubr.msk.f32.vlgmr.msra.gmra.mrb[0].mxu1 %vm162_vm7, %v156_v42 }
 0x32a   :  { %v236_v44 = vpop.f32.mrb[0].mxu1 }
 0x32b   :  { %v237_v45 = vadd.f32 %v236_v44, %v161_v43  ;;  %v314_v46 = vpop.f32.mrb[1].mxu1 }
 0x32d   :  { %v270_v47 = vmul.f32 -1.442695, %v237_v45 }
 0x32f   :  { %343 = vpow2.f32 %v270_v47 }
 0x339   :  { %v344_v48 = vpop.eup %343 }
 0x33a   :  { %v243_v49 = vadd.f32 1.0, %v344_v48 }
 0x33c   :  { %345 = vrcp.f32 %v243_v49 }
 0x346   :  { %v346_v50 = vpop.eup %345 }
 0x347   :  { %246 = vst [vmem:[#allocation5] sm:$0xff] %v346_v50 }
 0x348   :  { %370 = shalt.err (!%p367_p9)
}
 0x349   :  { %s371_s7 = scalar_lea.hbm %s490_s5, 128 }
 0x34a   :  { %p372_p10 = scmp.ne.s32.totalorder %s490_s5, %s371_s7  ;;  %p375_p11 = scmp.lt.u32.totalorder %s371_s7, %s490_s5 }
 0x34c   :  { %p377_p12 = pnand %p375_p11, %p372_p10 }
 0x34e   :  { %380 = shalt.err (!%p377_p12)
}
 0x34f   :  { %256 = dma.vmem_to_hbm [thread:$0]  %s254_s29, 128, %s490_s5, [#allocation3]  }
 0x350   :  { %383 = dma.done.wait [#allocation3], 128  }
 0x351   :  { %384 = vsyncadd [#allocation3], 4294967168 }
 0x352   :  { %260 = vsyncpa [#allocation3], 1 }
 0x353   :  { %261 = vsyncpa [#allocation4], 1 }

</bundles_post_ra>
